<compile_context>
chip_gen: v5e
topology: v5e:2x2
jax: 0.10.0
libtpu: 0.0.40
codegen_flags: <defaults>
</compile_context>

<pallas_src>
import jax
import jax.numpy as jnp
from jax.experimental import pallas as pl
from jax.experimental.pallas import tpu as pltpu


def mixer_block_kernel(x_ref, w_ref, b_ref, o_ref):
    # x_ref: (T, ft) input tile (batch dim squeezed), w_ref: (T, T) pre-masked weight,
    # b_ref: (T, 1) f32 bias column, o_ref: (T, ft) output tile.
    x = x_ref[...]
    w = w_ref[...]
    # Token mixing on the MXU: matmul_dtype operands, f32 accumulation.
    y = jnp.dot(w, x.astype(w.dtype), preferred_element_type=jnp.float32)
    # Bias (lane-broadcast) + residual in f32 on the VPU.
    o_ref[...] = (y + b_ref[...] + x.astype(jnp.float32)).astype(o_ref.dtype)


def _vmem_capacity_bytes():
    """Physical VMEM of the current TPU generation (conservative default: v7x)."""
    try:
        info = pltpu.get_tpu_info()
        cap = getattr(info, "vmem_capacity_bytes", None)
        if cap:
            return int(cap)
    except Exception:
        pass
    return 64 * 1024 * 1024


def _pick_feature_tile(T, F, B, elem_bytes, block_cap):
    """Largest multiple-of-128 divisor of F whose (T, ft) block fits block_cap."""
    divisors = [c for c in range(128, F + 1, 128) if F % c == 0]
    ft = 128
    for c in sorted(divisors, reverse=True):
        if T * c * elem_bytes <= block_cap:
            ft = c
            break
    # v7x megacore: keep at least 2 parallel grid points when possible.
    while B * (F // ft) < 2:
        smaller = [c for c in divisors if c < ft]
        if not smaller:
            break
        ft = max(smaller)
    return ft


def mixer_block(x, weight, bias, *, matmul_dtype=jnp.bfloat16, out_dtype=None):
    """x: (B, T, F); weight: (T, T); bias: (T,). Returns (B, T, F).

    matmul_dtype=jnp.float32 gives an exact-parity (slower) MXU path; passing x /
    requesting out_dtype in bf16 gives a reduced-precision streaming mode that
    halves HBM traffic on the memory-bound regime.
    """
    B, T, F = x.shape
    out_dtype = x.dtype if out_dtype is None else out_dtype

    # Causal mask applied once outside the kernel (matches torch.tril(weight)).
    w_masked = jnp.tril(weight).astype(matmul_dtype)          # (T, T)
    bias2d = bias.reshape(T, 1).astype(jnp.float32)           # (T, 1)

    x_bytes = jnp.dtype(x.dtype).itemsize
    o_bytes = jnp.dtype(out_dtype).itemsize
    w_bytes = jnp.dtype(matmul_dtype).itemsize

    vmem_cap = _vmem_capacity_bytes()
    # Bigger blocks amortize per-step overhead on 128-MiB parts; stay tighter on v7x.
    block_cap = (8 << 20) if vmem_cap >= (96 << 20) else (4 << 20)

    if F % 128 == 0:
        ft = _pick_feature_tile(T, F, B, max(x_bytes, o_bytes), block_cap)
    else:
        # Full-extent feature block: legal even when F is not a multiple of 128.
        # Covers the small-F / small-problem case with a fully-resident tile.
        ft = F

    grid = (B, F // ft)

    # The weight/bias block index never changes: single-buffer them once they are
    # large enough for double-buffering to hurt (keeps the demo path on defaults).
    big_weight = T * T * w_bytes > (2 << 20)
    if big_weight:
        w_spec = pl.BlockSpec((T, T), lambda b, j: (0, 0), pipeline_mode=pl.Buffered(1))
        b_spec = pl.BlockSpec((T, 1), lambda b, j: (0, 0), pipeline_mode=pl.Buffered(1))
        w_bufs = 1
    else:
        w_spec = pl.BlockSpec((T, T), lambda b, j: (0, 0))
        b_spec = pl.BlockSpec((T, 1), lambda b, j: (0, 0))
        w_bufs = 2

    # VMEM budget: double-buffered x/out blocks + resident weight + bias + headroom,
    # clamped against physical VMEM.
    need = (2 * T * ft * x_bytes + 2 * T * ft * o_bytes
            + w_bufs * T * T * w_bytes + 2 * max(T, 8) * 128 * 4)
    vmem_limit = int(min(max(32 << 20, need + (4 << 20)),
                         max(vmem_cap - (8 << 20), 16 << 20)))

    cost = pl.CostEstimate(
        flops=2 * T * T * B * F,
        transcendentals=0,
        bytes_accessed=B * T * F * (x_bytes + o_bytes) + T * T * w_bytes + T * 4,
    )

    return pl.pallas_call(
        mixer_block_kernel,
        out_shape=jax.ShapeDtypeStruct((B, T, F), out_dtype),
        grid_spec=pltpu.PrefetchScalarGridSpec(
            num_scalar_prefetch=0,
            grid=grid,
            in_specs=[
                pl.BlockSpec((None, T, ft), lambda b, j: (b, 0, j)),  # x tile (batch squeezed)
                w_spec,                                               # resident masked weight
                b_spec,                                               # bias column
            ],
            out_specs=pl.BlockSpec((None, T, ft), lambda b, j: (b, 0, j)),
        ),
        compiler_params=pltpu.CompilerParams(
            dimension_semantics=("parallel", "parallel"),
            vmem_limit_bytes=vmem_limit,
        ),
        cost_estimate=cost,
    )(x, w_masked, bias2d)


def _reference(x, weight, bias, dt):
    """Reference with the same operand dtype / f32 accumulation as the kernel."""
    wm = jnp.tril(weight)
    mix = jnp.einsum("ts,bsf->btf", wm.astype(dt), x.astype(dt),
                     preferred_element_type=jnp.float32)
    return mix + bias[None, :, None] + x


if __name__ == "__main__":
    # Small shapes consistent with the module: batch=2, length (tokens)=8, dim=32.
    B, LENGTH, DIM = 2, 8, 32

    key = jax.random.PRNGKey(0)
    kx, kw, kb = jax.random.split(key, 3)

    x = jax.random.normal(kx, (B, LENGTH, DIM), dtype=jnp.float32)

    # Deterministic Conv1d(length, length, 1) parameter init (torch-style uniform bound).
    bound = 1.0 / jnp.sqrt(jnp.float32(LENGTH))
    weight = jax.random.uniform(kw, (LENGTH, LENGTH), jnp.float32, -bound, bound)
    bias = jax.random.uniform(kb, (LENGTH,), jnp.float32, -bound, bound)

    out = jax.block_until_ready(mixer_block(x, weight, bias))
    assert out.shape == (B, LENGTH, DIM)

    # Tight check vs. a bf16-matmul/f32-accumulate reference.
    assert jnp.allclose(out, _reference(x, weight, bias, jnp.bfloat16),
                        atol=1e-4, rtol=1e-4)
    # Loose sanity check vs. full f32 math (bounds bf16 operand-rounding error).
    ref_f32 = jnp.einsum("ts,bsf->btf", jnp.tril(weight), x) + bias[None, :, None] + x
    assert jnp.allclose(out, ref_f32, atol=5e-2, rtol=5e-2)

    # Also exercise the lane-tiled (F % 128 == 0) main path at a slightly larger shape.
    B2, T2, F2 = 2, 128, 256
    k2x, k2w, k2b = jax.random.split(jax.random.PRNGKey(1), 3)
    x2 = jax.random.normal(k2x, (B2, T2, F2), dtype=jnp.float32)
    bound2 = 1.0 / jnp.sqrt(jnp.float32(T2))
    w2 = jax.random.uniform(k2w, (T2, T2), jnp.float32, -bound2, bound2)
    bias2 = jax.random.uniform(k2b, (T2,), jnp.float32, -bound2, bound2)

    out2 = jax.block_until_ready(mixer_block(x2, w2, bias2))
    assert out2.shape == (B2, T2, F2)
    assert jnp.allclose(out2, _reference(x2, w2, bias2, jnp.bfloat16),
                        atol=2e-3, rtol=2e-3)

    print("KERNEL_OK")
</pallas_src>

<mosaic_0001>
module attributes {stable_mosaic.version = 11 : i64} {
  func.func @mixer_block_kernel(%arg0: i32, %arg1: i32, %arg2: memref<1x8x32xf32, #tpu.memory_space<vmem>>, %arg3: memref<8x8xbf16, #tpu.memory_space<vmem>>, %arg4: memref<8x1xf32, #tpu.memory_space<vmem>>, %arg5: memref<1x8x32xf32, #tpu.memory_space<vmem>>) attributes {dimension_semantics = [#tpu.dimension_semantics<parallel>, #tpu.dimension_semantics<parallel>], iteration_bounds = array<i64: 2, 1>, scalar_prefetch = 0 : i64, scratch_operands = 0 : i64, tpu.core_type = #tpu.core_type<tc>, window_params = [{transform_indices = @transform_0, window_bounds = array<i64: 1, 8, 32>}, {pipeline_mode = #tpu.pipeline_mode<synchronous>, transform_indices = @transform_1, window_bounds = array<i64: 8, 8>}, {pipeline_mode = #tpu.pipeline_mode<synchronous>, transform_indices = @transform_2, window_bounds = array<i64: 8, 1>}, {transform_indices = @transform_3, window_bounds = array<i64: 1, 8, 32>}]} {
    %c0 = arith.constant 0 : index
    %c0_0 = arith.constant 0 : index
    %c0_1 = arith.constant 0 : index
    %0 = vector.load %arg2[%c0, %c0_0, %c0_1] : memref<1x8x32xf32, #tpu.memory_space<vmem>>, vector<1x8x32xf32>
    %1 = vector.shape_cast %0 : vector<1x8x32xf32> to vector<8x32xf32>
    %c0_2 = arith.constant 0 : index
    %c0_3 = arith.constant 0 : index
    %2 = vector.load %arg3[%c0_2, %c0_3] : memref<8x8xbf16, #tpu.memory_space<vmem>>, vector<8x8xbf16>
    %3 = arith.truncf %1 : vector<8x32xf32> to vector<8x32xbf16>
    %cst = arith.constant dense<0.000000e+00> : vector<8x32xf32>
    %4 = tpu.matmul %2, %3, %cst {dimension_numbers = #tpu.dot_dimension_numbers<[1], [0], [0], [1], [0, 0, 1, 1], [], []>} : vector<8x8xbf16>, vector<8x32xbf16>, vector<8x32xf32> -> vector<8x32xf32>
    %c0_4 = arith.constant 0 : index
    %c0_5 = arith.constant 0 : index
    %5 = vector.load %arg4[%c0_4, %c0_5] : memref<8x1xf32, #tpu.memory_space<vmem>>, vector<8x1xf32>
    %6 = vector.broadcast %5 : vector<8x1xf32> to vector<8x32xf32>
    %7 = arith.addf %4, %6 : vector<8x32xf32>
    %8 = arith.addf %7, %1 : vector<8x32xf32>
    %c0_6 = arith.constant 0 : index
    %c0_7 = arith.constant 0 : index
    %c0_8 = arith.constant 0 : index
    %9 = vector.load %arg5[%c0_6, %c0_7, %c0_8] : memref<1x8x32xf32, #tpu.memory_space<vmem>>, vector<1x8x32xf32>
    %10 = vector.shape_cast %9 : vector<1x8x32xf32> to vector<8x32xf32>
    %11 = vector.shape_cast %8 : vector<8x32xf32> to vector<1x8x32xf32>
    tpu.vector_store %arg5[%c0_6, %c0_7, %c0_8], %11 {strides = array<i32>} : memref<1x8x32xf32, #tpu.memory_space<vmem>>, vector<1x8x32xf32>,
    return
  }
  func.func @transform_0(%arg0: i32, %arg1: i32) -> (i32, i32, i32) {
    %c0_i32 = arith.constant 0 : i32
    %c0_i32_0 = arith.constant 0 : i32
    return %arg0, %c0_i32, %arg1 : i32, i32, i32
  }
  func.func @transform_1(%arg0: i32, %arg1: i32) -> (i32, i32) {
    %c0_i32 = arith.constant 0 : i32
    %c0_i32_0 = arith.constant 0 : i32
    %c0_i32_1 = arith.constant 0 : i32
    return %c0_i32, %c0_i32_0 : i32, i32
  }
  func.func @transform_2(%arg0: i32, %arg1: i32) -> (i32, i32) {
    %c0_i32 = arith.constant 0 : i32
    %c0_i32_0 = arith.constant 0 : i32
    %c0_i32_1 = arith.constant 0 : i32
    return %c0_i32, %c0_i32_0 : i32, i32
  }
  func.func @transform_3(%arg0: i32, %arg1: i32) -> (i32, i32, i32) {
    %c0_i32 = arith.constant 0 : i32
    %c0_i32_0 = arith.constant 0 : i32
    return %arg0, %c0_i32, %arg1 : i32, i32, i32
  }
}

</mosaic_0001>

<bundles_post_ra>
// kernel: tpu_custom_call.1
= control target key start
LH: loop header
LB: loop body
LE: loop exit
PB: predicated region body
PF: predicated region fallthrough
CT: control target
= control target key end

     0   :  { %8 = vsyncpa [#allocation3], 0  ;;  %s675_s0 = inlined_call_operand.hbm [shape: f32[2,8,32], index: 0, kind: input, shape index: {}]   ;;  %s676_s1 = inlined_call_operand.vmem [shape: bf16[8,8], index: 1, kind: input, shape index: {}]   ;;  %s677_s2 = inlined_call_operand.vmem [shape: f32[8,1], index: 2, kind: input, shape index: {}]   ;;  %s678_s3 = inlined_call_operand.hbm [shape: f32[2,8,32], index: 3, kind: output, shape index: {}]  }
   0x1   :  { %10 = vsyncpa [#allocation3 + $0x1], 0 }
   0x2   :  { %11 = vsyncpa [#allocation4], 0 }
   0x3   :  { %13 = vsyncpa [#allocation4 + $0x1], 0  ;;  %s549_s12 = smov 0   ;;  %s551_s13 = smov 0  }
   0x4   :  { %s553_s14 = smov 0   ;;  %s555_s15 = smov 0  }
   0x5   :  { %s557_s16 = smov 0   ;;  %s559_s17 = smov 0  }
   0x6 LB: > { %s336_s18 = sadd.s32 4294967295, %s526_s17   ;;  %s337_s19 = sadd.s32 4294967294, %s526_s17   ;;  %s526_s17 = sphi %s559_s17, %s19_s17   ;;  %s522_s16 = sphi %s557_s16, %s687_s16   ;;  %s518_s15 = sphi %s555_s15, %s686_s15   ;;  %s514_s14 = sphi %s553_s14, %s685_s14   ;;  %s510_s13 = sphi %s551_s13, %s684_s13   ;;  %s506_s12 = sphi %s549_s12, %s683_s12  }
   0x7   : > { %s31_s20 = sadd.s32 1, %s522_s16  ;;  %s40_s21 = sadd.s32 1, %s514_s14 }
   0x8   : > { %p33_p0 = scmp.ge.s32.totalorder %s31_s20, 2  ;;  %p47_p1 = scmp.ne.s32.totalorder %s514_s14, %s510_s13 }
   0x9   : > { %p48_p2 = scmp.eq.s32.totalorder %s526_s17, 0  ;;  %p53_p3 = scmp.ne.s32.totalorder %s510_s13, %s506_s12 }
   0xa   : > { %s689_s20 = smov (%p33_p0, %s31_s20), 0  ;;  %p54_p5 = scmp.eq.s32.totalorder %s336_s18, 0 }
   0xb   : > { %p590_p4 = por %p48_p2, %p47_p1  ;;  %s35_s23 = ssub.s32 %s522_s16, %s689_s20 }
   0xc   : > { %p121_p6 = scmp.eq.s32.totalorder %s336_s18, 1  ;;  %p38_p7 = scmp.eq.s32.totalorder %s35_s23, 0 }
   0xd   : > { %p596_p8 = por %p54_p5, %p53_p3  ;;  %p127_p10 = scmp.eq.s32.totalorder %s337_s19, 1 }
   0xe   : > { %p600_p9 = por %p121_p6, %p47_p1  ;;  %p339_p12 = scmp.ge.s32.totalorder %s526_s17, 2 }
   0xf   : > { %s605_s26 = scalar_select %p38_p7, %s514_s14, %s40_s21  }
  0x10   : > { %p607_p11 = por %p127_p10, %p53_p3  ;;  %p362_p13 = scmp.lt.s32.totalorder %s526_s17, 2 }
  0x11   : > { %s153_s28 = sand.u32 1, %s514_s14   ;;  %s341_s30 = sshll.u32 %s522_s16, 3 }
  0x12   : > { %s340_s29 = sshll.u32 %s153_s28, 3  ;;  %s162_s6 = scalar_lea.hbm %s675_s0, %s341_s30 }
  0x13   : > { %s157_s7 = scalar_lea.vmem [#allocation2], %s340_s29  ;;  %s164_s9 = sshll.u32 %s162_s6, 4  ;;  %s165_s9 = int_to_ptr.hbm [resolvable:$true] %s164_s9 }
  0x14   : > { %s166_s8 = sshll.u32 %s157_s7, 4  ;;  %p355_p0 = pnand %p362_p13, %p590_p4  ;;  %s167_s8 = int_to_ptr.vmem [resolvable:$true] %s166_s8 }
  0x15   : > { %p342_p1 = scmp.ge.s32.totalorder %s526_s17, 1  ;;  %p171_p2 = scmp.lt.s32.totalorder %s526_s17, 3 }
  0x16   : > { %s154_s10 = scalar_lea.sflag [#allocation3], %s153_s28 }
  0x17   : > { %357 = dma.hbm_to_vmem [thread:$0]  (!%p355_p0), %s165_s9, 128, %s167_s8, %s154_s10  }
  0x18   : > { %p172_p3 = pnand %p342_p1, %p171_p2 }
  0x19   : > { %s623_s11 = sand.u32 (!%p172_p3), 1, %s510_s13  }
  0x1a   : > { %175 = sbr.rel (%p172_p3) target bundleno = 173 (0xad), region = 32  ;;  %s343_s18 = sshll.u32 (!%p172_p3), %s623_s11, 3 }
  0x1b   : > { %s178_s19 = scalar_lea.sflag (!%p172_p3), [#allocation3], %s623_s11  ;;  %s181_s21 = scalar_lea.vmem (!%p172_p3), [#allocation2], %s343_s18 }
  0x1f   : > { %497 = dma.done.wait (%p596_p8), %s178_s19, 128  }
  0x20   : > { %499 = vsyncadd (%p596_p8), %s178_s19, 4294967168  ;;  %v528_v0 = vmov 0   ;;  %v206_v1 = vld [vmem:[%s181_s21] sm:$0xff]  ;;  %vm219_vm0 = vcmask 1043456   ;;  %vm215_vm1 = vcmask 64512   ;;  %s347_s24 = sshll.u32 %s518_s15, 3 }
  0x21   : > { %413 = vset.pattern.permute.xlu0 %v528_v0  ;;  %v209_v2 = vld [vmem:[%s677_s2] sm:$0xff]  ;;  %v208_v3 = vpack.c.bf16 %v206_v1, %v206_v1  ;;  %s251_s5 = scalar_lea.hbm %s678_s3, %s347_s24  ;;  %s204_s6 = scalar_lea.vmem [#allocation5], %s343_s18  ;;  %vm237_vm2 = vcmask 261120  }
  0x22   : > { %212 = vperm.xlu0 %413, %v209_v2   ;;  %v207_v5 = vld [vmem:[%s676_s1] sm:$0xf]  ;;  %s253_s7 = sshll.u32 %s204_s6, 4  ;;  %s255_s8 = sshll.u32 %s251_s5, 4  ;;  %s254_s7 = int_to_ptr.vmem [resolvable:$true] %s253_s7  ;;  %s256_s8 = int_to_ptr.hbm [resolvable:$true] %s255_s8 }
  0x23   : > { %v221_v4 = vsel %vm219_vm0, %v208_v3, 0  ;;  %s240_s9 = scalar_lea.sflag [#allocation4], %s623_s11  ;;  %s458_s10 = sshra.s32 %s256_s8, 4  ;;  %s459_s10 = int_to_ptr.hbm [resolvable:$true] %s458_s10 }
  0x24   : > { %230 = vmatpush.bf16.msra.mxu0 %v221_v4  ;;  %s460_s15 = scalar_lea.hbm %s459_s10, 8  ;;  %s464_s18 = scalar_lea.hbm %s678_s3, 16 }
  0x25   : > { %p461_p4 = scmp.ne.s32.totalorder %s459_s10, %s460_s15  ;;  %p465_p7 = scmp.lt.s32.totalorder %s459_s10, %s678_s3 }
  0x26   : > { %p466_p8 = scmp.lt.s32.totalorder %s464_s18, %s460_s15 }
  0x27   : > { %345 = vmatmul.msk.bf16.vlgmr.msra.gmra.mxu0 %vm215_vm1, %v207_v5  ;;  %p462_p5 = pnand %p461_p4, %p600_p9 }
  0x28   : > { %p467_p10 = por %p466_p8, %p465_p7 }
  0x29   : > { %p463_p6 = pneg %p462_p5 }
  0x2b   : > { %p468_p13 = pnand %p467_p10, %p463_p6 }
  0x94   : > { %v213_v6 = vpop.permute.xlu0 %212 }
  0xa4   : > { %v232_v7 = vpop.f32.mrf.mxu0 }
  0xa5   : > { %v233_v8 = vadd.f32 %v232_v7, %v213_v6 }
  0xa7   : > { %v236_v9 = vadd.f32 %v233_v8, %v206_v1 }
  0xa9   : > { %238 = vst.msk [vmem:[%s204_s6] sm:$0xff] %vm237_vm2, %v236_v9 }
  0xaa   : > { %471 = shalt.err (!%p468_p13)
}
  0xab   : > { %352 = dma.vmem_to_hbm [thread:$0]  (%p600_p9), %s254_s7, 128, %s256_s8, %s240_s9  }
  0xac   : > { %v234_v10 = vpop.f32.mrf.mxu0 }
  0xad PF: > { %s267_s11 = sand.u32 1, %s506_s12   ;;  %p359_p0 = pnand %p339_p12, %p607_p11 }
  0xae   : > { %s268_s28 = scalar_lea.sflag [#allocation4], %s267_s11 }
  0xaf   : > { %p360_p1 = pneg %p359_p0 }
  0xb1   : > { %501 = dma.done.wait (%p360_p1), %s268_s28, 128  }
  0xb2   : > { %503 = vsyncadd (%p360_p1), %s268_s28, 4294967168  ;;  %s19_s17 = sadd.s32 1, %s526_s17   ;;  %s683_s12 = smov %s510_s13 }
  0xb3   : > { %p16_p2 = scmp.ge.s32.totalorder %s19_s17, 4   ;;  %s684_s13 = smov %s514_s14 }
  0xb4   : > { %s685_s14 = smov %s605_s26  ;;  %s686_s15 = smov %s522_s16 }
  0xb5   : > { %s687_s16 = smov %s689_s20  ;;  %18 = sbr.rel (!%p16_p2) target bundleno = 6 (0x6), region = 77 }
  0xba   :  { %274 = vsyncpa [#allocation3], 1 }
  0xbb   :  { %276 = vsyncpa [#allocation3 + $0x1], 1 }
  0xbc   :  { %277 = vsyncpa [#allocation4], 1 }
  0xbd   :  { %279 = vsyncpa [#allocation4 + $0x1], 1 }

</bundles_post_ra>
